<compile_context>
chip_gen: v7x
topology: tpu7x:2x2x1
jax: 0.10.0
libtpu: 0.0.40
codegen_flags: <defaults>
</compile_context>

<pallas_src>
import jax
import jax.numpy as jnp
from jax.experimental import pallas as pl
from jax.experimental.pallas import tpu as pltpu


def mlb_head_kernel(x_ref, wemb_ref, bemb_ref, whead_ref, bhead_ref, out_ref):
    # Fused embedding matmul: [e_pre | n_pre] = [eeg | nirs] @ blockdiag(we, wn) + [be | bn]
    pre = (jnp.dot(x_ref[...], wemb_ref[...],
                   preferred_element_type=jnp.float32)
           + bemb_ref[...])
    t = jnp.tanh(pre)                         # f32 tanh on the EUP (v5e-safe)
    emb = t.shape[-1] // 2
    joint = t[:, :emb] * t[:, emb:]           # MLB elementwise fusion, f32 on VPU
    # Folded head: proj_joint and fc composed into a single (emb_dim, 2) matmul.
    out_ref[...] = (jnp.dot(joint.astype(whead_ref.dtype), whead_ref[...],
                            preferred_element_type=jnp.float32)
                    + bhead_ref[...])


def mlb_hybrid_forward(eeg_feat, nirs_feat, params, *, block_b=512):
    """MLB hybrid head + final fc, starting from CRNN feature outputs."""
    we, be, wn, bn, wp, bp, wfc, bfc = params
    eeg_dim, emb_dim = we.shape
    nirs_dim = wn.shape[0]
    out2 = wfc.shape[1]  # = 2

    # --- host-side algebraic folding (exact up to rounding) ---------------
    # 1) fused embedding weight: block-diagonal (eeg_dim+nirs_dim, 2*emb_dim)
    w_emb = jnp.zeros((eeg_dim + nirs_dim, 2 * emb_dim), jnp.float32)
    w_emb = w_emb.at[:eeg_dim, :emb_dim].set(we)
    w_emb = w_emb.at[eeg_dim:, emb_dim:].set(wn)
    b_emb = jnp.concatenate([be.reshape(1, -1), bn.reshape(1, -1)], axis=1)
    # 2) fold proj_joint + fc
    w_head = wp @ wfc                                      # (emb_dim, 2)
    b_head = bp.reshape(1, -1) @ wfc + bfc.reshape(1, -1)  # (1, 2)

    # bf16 storage for MXU operands (f32 accumulation inside the kernel).
    x = jnp.concatenate([eeg_feat, nirs_feat], axis=1).astype(jnp.bfloat16)
    w_emb = w_emb.astype(jnp.bfloat16)
    w_head = w_head.astype(jnp.bfloat16)

    B, d_in = x.shape
    # Batch tile: full batch when small (block == array dims is always legal),
    # otherwise a large multiple-of-8 tile so the feature DMA pipelines well.
    tb = B if B <= block_b else block_b
    b_pad = -B % tb
    if b_pad:
        x = jnp.pad(x, ((0, b_pad), (0, 0)))
    b_padded = B + b_pad
    grid = (b_padded // tb,)

    out = pl.pallas_call(
        mlb_head_kernel,
        out_shape=jax.ShapeDtypeStruct((b_padded, out2), jnp.float32),
        grid=grid,
        in_specs=[
            pl.BlockSpec((tb, d_in), lambda i: (i, 0)),          # features: tiled over batch
            pl.BlockSpec(w_emb.shape, lambda i: (0, 0)),         # weights: VMEM-resident
            pl.BlockSpec(b_emb.shape, lambda i: (0, 0)),
            pl.BlockSpec(w_head.shape, lambda i: (0, 0)),
            pl.BlockSpec(b_head.shape, lambda i: (0, 0)),
        ],
        out_specs=pl.BlockSpec((tb, out2), lambda i: (i, 0)),
        compiler_params=pltpu.CompilerParams(
            dimension_semantics=("parallel",)),                  # v7x: shard batch over 2 TCs
    )(x, w_emb, b_emb, w_head, b_head)
    return out[:B]


def init_linear(key, in_dim, out_dim):
    # PyTorch nn.Linear default: U(-1/sqrt(in), 1/sqrt(in)); weights stored (in, out)
    kw, kb = jax.random.split(key)
    bound = 1.0 / (in_dim ** 0.5)
    w = jax.random.uniform(kw, (in_dim, out_dim), jnp.float32, -bound, bound)
    b = jax.random.uniform(kb, (1, out_dim), jnp.float32, -bound, bound)
    return w, b


def reference_forward(eeg_feat, nirs_feat, params):
    we, be, wn, bn, wp, bp, wfc, bfc = params
    e = jnp.tanh(eeg_feat @ we + be)
    n = jnp.tanh(nirs_feat @ wn + bn)
    out = (e * n) @ wp + bp
    return out @ wfc + bfc


if __name__ == "__main__":
    # Small, deterministic shapes consistent with the module's forward.
    B = 8
    eeg_dim, nirs_dim, emb_dim, out_dim = 32, 16, 32, 32

    key = jax.random.PRNGKey(0)
    k_eeg, k_nirs, k1, k2, k3, k4 = jax.random.split(key, 6)

    eeg_feat = jax.random.normal(k_eeg, (B, eeg_dim), jnp.float32)
    nirs_feat = jax.random.normal(k_nirs, (B, nirs_dim), jnp.float32)

    we, be = init_linear(k1, eeg_dim, emb_dim)    # emb_eeg
    wn, bn = init_linear(k2, nirs_dim, emb_dim)   # emb_nirs
    wp, bp = init_linear(k3, emb_dim, out_dim)    # proj_joint
    wfc, bfc = init_linear(k4, out_dim, 2)        # final fc -> 2
    params = (we, be, wn, bn, wp, bp, wfc, bfc)

    out = jax.block_until_ready(mlb_hybrid_forward(eeg_feat, nirs_feat, params))
    ref = reference_forward(eeg_feat, nirs_feat, params)

    assert out.shape == (B, 2)
    # bf16 storage of MXU operands -> a few 1e-3-level deviations vs the f32 reference.
    assert jnp.allclose(out, ref, atol=3e-2, rtol=3e-2), "mismatch vs. JAX reference"

    print("KERNEL_OK")
</pallas_src>

<mosaic_0001>
module attributes {stable_mosaic.version = 11 : i64} {
  func.func @mlb_head_kernel(%arg0: i32, %arg1: memref<8x48xbf16, #tpu.memory_space<vmem>>, %arg2: memref<48x64xbf16, #tpu.memory_space<vmem>>, %arg3: memref<1x64xf32, #tpu.memory_space<vmem>>, %arg4: memref<32x2xbf16, #tpu.memory_space<vmem>>, %arg5: memref<1x2xf32, #tpu.memory_space<vmem>>, %arg6: memref<8x2xf32, #tpu.memory_space<vmem>>) attributes {dimension_semantics = [#tpu.dimension_semantics<parallel>], iteration_bounds = array<i64: 1>, scalar_prefetch = 0 : i64, scratch_operands = 0 : i64, tpu.core_type = #tpu.core_type<tc>, window_params = [{transform_indices = @transform_0, window_bounds = array<i64: 8, 48>}, {pipeline_mode = #tpu.pipeline_mode<synchronous>, transform_indices = @transform_1, window_bounds = array<i64: 48, 64>}, {pipeline_mode = #tpu.pipeline_mode<synchronous>, transform_indices = @transform_2, window_bounds = array<i64: 1, 64>}, {pipeline_mode = #tpu.pipeline_mode<synchronous>, transform_indices = @transform_3, window_bounds = array<i64: 32, 2>}, {pipeline_mode = #tpu.pipeline_mode<synchronous>, transform_indices = @transform_4, window_bounds = array<i64: 1, 2>}, {transform_indices = @transform_5, window_bounds = array<i64: 8, 2>}]} {
    %c0 = arith.constant 0 : index
    %c0_0 = arith.constant 0 : index
    %0 = vector.load %arg1[%c0, %c0_0] : memref<8x48xbf16, #tpu.memory_space<vmem>>, vector<8x48xbf16>
    %c0_1 = arith.constant 0 : index
    %c0_2 = arith.constant 0 : index
    %1 = vector.load %arg2[%c0_1, %c0_2] : memref<48x64xbf16, #tpu.memory_space<vmem>>, vector<48x64xbf16>
    %cst = arith.constant dense<0.000000e+00> : vector<8x64xf32>
    %2 = tpu.matmul %0, %1, %cst {dimension_numbers = #tpu.dot_dimension_numbers<[1], [0], [0], [1], [0, 0, 1, 1], [], []>} : vector<8x48xbf16>, vector<48x64xbf16>, vector<8x64xf32> -> vector<8x64xf32>
    %c0_3 = arith.constant 0 : index
    %c0_4 = arith.constant 0 : index
    %3 = vector.load %arg3[%c0_3, %c0_4] : memref<1x64xf32, #tpu.memory_space<vmem>>, vector<1x64xf32>
    %4 = vector.broadcast %3 : vector<1x64xf32> to vector<8x64xf32>
    %5 = arith.addf %2, %4 : vector<8x64xf32>
    %6 = math.tanh %5 : vector<8x64xf32>
    %7 = vector.extract_strided_slice %6 {offsets = [0, 0], sizes = [8, 32], strides = [1, 1]} : vector<8x64xf32> to vector<8x32xf32>
    %8 = vector.extract_strided_slice %6 {offsets = [0, 32], sizes = [8, 32], strides = [1, 1]} : vector<8x64xf32> to vector<8x32xf32>
    %9 = arith.mulf %7, %8 : vector<8x32xf32>
    %10 = arith.truncf %9 : vector<8x32xf32> to vector<8x32xbf16>
    %c0_5 = arith.constant 0 : index
    %c0_6 = arith.constant 0 : index
    %11 = vector.load %arg4[%c0_5, %c0_6] : memref<32x2xbf16, #tpu.memory_space<vmem>>, vector<32x2xbf16>
    %cst_7 = arith.constant dense<0.000000e+00> : vector<8x2xf32>
    %12 = tpu.matmul %10, %11, %cst_7 {dimension_numbers = #tpu.dot_dimension_numbers<[1], [0], [0], [1], [0, 0, 1, 1], [], []>} : vector<8x32xbf16>, vector<32x2xbf16>, vector<8x2xf32> -> vector<8x2xf32>
    %c0_8 = arith.constant 0 : index
    %c0_9 = arith.constant 0 : index
    %13 = vector.load %arg5[%c0_8, %c0_9] : memref<1x2xf32, #tpu.memory_space<vmem>>, vector<1x2xf32>
    %14 = vector.broadcast %13 : vector<1x2xf32> to vector<8x2xf32>
    %15 = arith.addf %12, %14 : vector<8x2xf32>
    %c0_10 = arith.constant 0 : index
    %c0_11 = arith.constant 0 : index
    %16 = vector.load %arg6[%c0_10, %c0_11] : memref<8x2xf32, #tpu.memory_space<vmem>>, vector<8x2xf32>
    tpu.vector_store %arg6[%c0_10, %c0_11], %15 {strides = array<i32>} : memref<8x2xf32, #tpu.memory_space<vmem>>, vector<8x2xf32>,
    return
  }
  func.func @transform_0(%arg0: i32) -> (i32, i32) {
    %c0_i32 = arith.constant 0 : i32
    %c0_i32_0 = arith.constant 0 : i32
    return %arg0, %c0_i32 : i32, i32
  }
  func.func @transform_1(%arg0: i32) -> (i32, i32) {
    %c0_i32 = arith.constant 0 : i32
    %c0_i32_0 = arith.constant 0 : i32
    %c0_i32_1 = arith.constant 0 : i32
    return %c0_i32, %c0_i32_0 : i32, i32
  }
  func.func @transform_2(%arg0: i32) -> (i32, i32) {
    %c0_i32 = arith.constant 0 : i32
    %c0_i32_0 = arith.constant 0 : i32
    %c0_i32_1 = arith.constant 0 : i32
    return %c0_i32, %c0_i32_0 : i32, i32
  }
  func.func @transform_3(%arg0: i32) -> (i32, i32) {
    %c0_i32 = arith.constant 0 : i32
    %c0_i32_0 = arith.constant 0 : i32
    %c0_i32_1 = arith.constant 0 : i32
    return %c0_i32, %c0_i32_0 : i32, i32
  }
  func.func @transform_4(%arg0: i32) -> (i32, i32) {
    %c0_i32 = arith.constant 0 : i32
    %c0_i32_0 = arith.constant 0 : i32
    %c0_i32_1 = arith.constant 0 : i32
    return %c0_i32, %c0_i32_0 : i32, i32
  }
  func.func @transform_5(%arg0: i32) -> (i32, i32) {
    %c0_i32 = arith.constant 0 : i32
    %c0_i32_0 = arith.constant 0 : i32
    return %arg0, %c0_i32 : i32, i32
  }
}

</mosaic_0001>

<bundles_post_ra>
// kernel: tpu_custom_call.1
= control target key start
LH: loop header
LB: loop body
LE: loop exit
PB: predicated region body
PF: predicated region fallthrough
CT: control target
= control target key end

     0   :  { %10 = vsyncpa [#allocation3], 0  ;;  %s263_s18 = smov [#allocation2]   ;;  %s329_s0 = inlined_call_operand.vmem [shape: bf16[8,48], index: 0, kind: input, shape index: {}]   ;;  %s330_s1 = inlined_call_operand.hbm [shape: bf16[48,64], index: 1, kind: input, shape index: {}]   ;;  %s331_s2 = inlined_call_operand.vmem [shape: f32[1,64], index: 2, kind: input, shape index: {}]   ;;  %s332_s3 = inlined_call_operand.vmem [shape: bf16[32,2], index: 3, kind: input, shape index: {}]   ;;  %s333_s4 = inlined_call_operand.vmem [shape: f32[1,2], index: 4, kind: input, shape index: {}]   ;;  %s334_s5 = inlined_call_operand.vmem [shape: f32[8,2], index: 5, kind: output, shape index: {}]  }
   0x1   :  { %s18_s19 = sshll.u32 %s263_s18, 4  ;;  %s239_s22 = scalar_lea.hbm %s330_s1, 384  ;;  %s19_s19 = int_to_ptr.vmem [resolvable:$true] %s18_s19 }
   0x2   :  { %p240_p0 = scmp.ne.s32.totalorder %s330_s1, %s239_s22  ;;  %p243_p1 = scmp.lt.u32.totalorder %s239_s22, %s330_s1 }
   0x4   :  { %p245_p2 = pnand %p243_p1, %p240_p0 }
   0x6   :  { %248 = shalt.err (!%p245_p2)
}
   0x7   :  { %s249_s27 = scalar_lea.vmem %s19_s19, 384  ;;  %p254_p4 = scmp.lt.s32.totalorder %s19_s19, %s19_s19 }
   0x8   :  { %p250_p3 = scmp.ne.s32.totalorder %s19_s19, %s249_s27  ;;  %p255_p5 = scmp.lt.s32.totalorder %s249_s27, %s249_s27 }
   0xa   :  { %p256_p6 = por %p255_p5, %p254_p4 }
   0xc   :  { %p257_p7 = pnand %p256_p6, %p250_p3 }
   0xe   :  { %260 = shalt.err (!%p257_p7)
}
   0xf   :  { %s264_s28 = smov 64   ;;  %s265_s29 = smov 4  }
  0x10   :  { %24 = dma.hbm_to_vmem [thread:$0]  %s330_s1, 384, %s19_s19, [#allocation3], %s264_s28, %s264_s28, %s265_s29  }
  0x11   :  { %261 = dma.done.wait [#allocation3], 384  }
  0x12   :  { %262 = vsyncadd [#allocation3], 4294966912  ;;  %v266_v0 = vmov 0.0   ;;  %vm267_vm0 = vmmov 0   ;;  %v232_v1 = vld [vmem:[#allocation2] sm:$0xff]   ;;  %v233_v2 = vld [vmem:[#allocation2 + $0x8] sm:$0xff]  }
  0x13   :  { %208 = vmatprep.subr.bf16.mxu0 %v266_v0  ;;  %214 = vmatprep.mubr.msk.bf16.mxu0 %vm267_vm0, %v266_v0  ;;  %v234_v3 = vld [vmem:[#allocation2 + $0x10] sm:$0xff]   ;;  %v35_v4 = vld [vmem:[%s329_s0] sm:$0xf]  ;;  %vm67_vm1 = vcmask 392192   ;;  %v236_v8 = vld [vmem:[%s332_s3 + $0x8] sm:$0xff]   ;;  %s268_s0 = smov 96  }
  0x14   :  { %218 = vmatprep.subr.bf16.mxu1 %v266_v0  ;;  %222 = vmatprep.mubr.msk.bf16.mxu1 %vm267_vm0, %v266_v0  ;;  %v235_v5 = vld [vmem:[%s332_s3] sm:$0xff]   ;;  %vm141_vm2 = vcmask 261120   ;;  %vm185_vm3 = vcmask 15360  }
  0x15   :  { %209 = vmatpush3.bf16.msra.mxu0 %v232_v1  ;;  %219 = vmatpush3.bf16.msra.mxu1 %v235_v5  ;;  %v192_v6 = vld [vmem:[%s331_s2] ss:$0 sm:$0xff] }
  0x16   :  { %210 = vmatprep.subr.bf16.mxu0 %v266_v0  ;;  %220 = vmatprep.subr.bf16.mxu1 %v266_v0  ;;  %v197_v17 = vld [vmem:[%s333_s4] ss:$0 sm:$0xff] }
  0x19   :  { %211 = vmatpush3.bf16.msra.mxu0 %v233_v2  ;;  %221 = vmatpush3.bf16.msra.mxu1 %v236_v8 }
  0x1a   :  { %212 = vmatprep.subr.bf16.mxu0 %v266_v0 }
  0x1d   :  { %213 = vmatpush3.bf16.msra.mxu0 %v234_v3 }
  0x20   :  { %215 = vmatmul.mubr.msk.bf16.vlgmr.msra.gmra.mrb[0].mxu0 %vm67_vm1, %v35_v4 }
  0xf3   :  { %v105_v7 = vpop.f32.mrb[0].mxu0 }
  0xf4   :  { %v106_v9 = vadd.f32 %v192_v6, %v105_v7  ;;  %v216_v10 = vpop.f32.mrb[1].mxu0 }
  0xf5   :  { %v108_v11 = vpop.f32.mrb[2].mxu0 }
  0xf6   :  { %237 = vtanh.f32 %v106_v9  ;;  %v217_v12 = vpop.f32.mrb[3].mxu0 }
 0x100   :  { %v238_v13 = vpop.eup %237 }
 0x101   :  { %113 = vrot.lane.b32.xlu0 %v238_v13, %s268_s0 }
 0x173   :  { %v114_v14 = vpop.permute.xlu0 %113 }
 0x174   :  { %v116_v15 = vmul.f32 %v238_v13, %v114_v14 }
 0x176   :  { %v117_v16 = vpack.c.bf16 %v116_v15, %v116_v15 }
 0x178   :  { %223 = vmatmul.mubr.msk.bf16.vlgmr.msra.gmra.mrb[0].mxu1 %vm141_vm2, %v117_v16 }
 0x24b   :  { %v179_v18 = vpop.f32.mrb[0].mxu1 }
 0x24c   :  { %v180_v19 = vadd.f32 %v197_v17, %v179_v18  ;;  %v224_v20 = vpop.f32.mrb[1].mxu1 }
 0x24d   :  { %v182_v21 = vpop.f32.mrb[2].mxu1 }
 0x24e   :  { %186 = vst.msk [vmem:[%s334_s5] sm:$0xff] %vm185_vm3, %v180_v19  ;;  %v225_v22 = vpop.f32.mrb[3].mxu1 }
 0x24f   :  { %191 = vsyncpa [#allocation3], 1 }

</bundles_post_ra>
